<compile_context>
chip_gen: v6e
topology: v6e:2x2x1
jax: 0.10.0
libtpu: 0.0.40
codegen_flags: <defaults>
</compile_context>

<pallas_src>
import functools

import jax
import jax.numpy as jnp
from jax.experimental import pallas as pl
from jax.experimental.pallas import tpu as pltpu


def _round_up(n, m):
    return ((n + m - 1) // m) * m


def _coco_kernel(x_ref, c_ref, invc_ref, o_ref, *, alpha, mm_dtype):
    x = x_ref[...].astype(jnp.float32)          # [tb, F]
    c = c_ref[...].astype(jnp.float32)          # [tc, F]
    inv_c = invc_ref[...]                       # [tc, 1] f32, 1/max(||c||, eps)

    # max(||v||, 1e-12) == sqrt(max(||v||^2, 1e-24)); rsqrt lowers to the EUP.
    eps2 = jnp.float32(1e-24)
    inv_x = jax.lax.rsqrt(
        jnp.maximum(jnp.sum(x * x, axis=-1, keepdims=True), eps2))
    x_hat = x * (jnp.float32(alpha) * inv_x)    # [tb, F]
    c_hat = c * inv_c                           # [tc, F]

    # Contract last axes directly: [tb, F] x [tc, F] -> [tb, tc] (no transpose).
    logits = jax.lax.dot_general(
        x_hat.astype(mm_dtype), c_hat.astype(mm_dtype),
        (((1,), (1,)), ((), ())),
        preferred_element_type=jnp.float32)
    o_ref[...] = logits.astype(o_ref.dtype)


def coco_linear(x, centers, alpha, *, block_b=256, block_c=256,
                mm_dtype=jnp.bfloat16, out_dtype=None):
    """x: [B, nfeat], centers: [nclass, nfeat] -> logits [B, nclass]."""
    B, F = x.shape
    C, F2 = centers.shape
    assert F == F2, "feature dims must match"
    assert block_b % 8 == 0 and block_c % 128 == 0
    out_dtype = x.dtype if out_dtype is None else out_dtype

    # ---- class axis: pad to a lane-dense multiple of 128 and pick a tile tc
    # that divides it (<= block_c).  Zero-padded rows normalize to exactly zero
    # logits, so the extra columns are sliced off afterwards (exact).
    C_pad = _round_up(C, 128)
    m = C_pad // 128
    tc = 128
    for d in range(min(block_c // 128, m), 0, -1):
        if m % d == 0:
            tc = 128 * d
            break
    n_c = C_pad // tc

    c_padded = centers if C_pad == C else jnp.pad(centers, ((0, C_pad - C), (0, 0)))

    # Per-row inverse norms of the centers, computed once (not per grid step).
    inv_c = jax.lax.rsqrt(
        jnp.maximum(
            jnp.sum(jnp.square(c_padded.astype(jnp.float32)), axis=-1,
                    keepdims=True),
            jnp.float32(1e-24)))                           # [C_pad, 1] f32

    # ---- batch axis: no wrapper padding; ragged last tile is masked by Pallas.
    tb = min(block_b, _round_up(B, 8))
    n_b = pl.cdiv(B, tb)
    if n_b * n_c < 2 and B >= 16:
        # Ensure >= 2 grid steps so both TensorCores (v7x megacore) get work.
        tb = _round_up(pl.cdiv(B, 2), 8)
        n_b = pl.cdiv(B, tb)

    # ---- grid order: stream the larger operand once, re-read the smaller one.
    class_outer = (C_pad * F + B * F * n_c) < (B * F + C_pad * F * n_b)
    if class_outer:
        grid = (n_c, n_b)
        x_spec = pl.BlockSpec((tb, F), lambda j, i: (i, 0))
        c_spec = pl.BlockSpec((tc, F), lambda j, i: (j, 0))
        v_spec = pl.BlockSpec((tc, 1), lambda j, i: (j, 0))
        o_spec = pl.BlockSpec((tb, tc), lambda j, i: (i, j))
        x_reads, c_reads = n_c, 1
    else:
        grid = (n_b, n_c)
        x_spec = pl.BlockSpec((tb, F), lambda i, j: (i, 0))
        c_spec = pl.BlockSpec((tc, F), lambda i, j: (j, 0))
        v_spec = pl.BlockSpec((tc, 1), lambda i, j: (j, 0))
        o_spec = pl.BlockSpec((tb, tc), lambda i, j: (i, j))
        x_reads, c_reads = 1, n_b

    # ---- VMEM budget: double-buffered tiles + headroom; safe on v7x (64 MiB).
    xb = jnp.dtype(x.dtype).itemsize
    cb = jnp.dtype(centers.dtype).itemsize
    ob = jnp.dtype(out_dtype).itemsize
    footprint = 2 * (tb * F * xb + tc * F * cb + tc * 4 + tb * tc * ob)
    vmem_limit = int(min(max(2 * footprint, 32 * 1024 * 1024), 64 * 1024 * 1024))

    cost = pl.CostEstimate(
        flops=2 * B * C_pad * F + 3 * B * F * n_c + 2 * C_pad * F,
        transcendentals=B * n_c,
        bytes_accessed=(B * F * xb * x_reads + C_pad * F * cb * c_reads
                        + C_pad * 4 * c_reads + B * C_pad * ob),
    )

    kernel = functools.partial(_coco_kernel, alpha=float(alpha),
                               mm_dtype=mm_dtype)

    out = pl.pallas_call(
        kernel,
        out_shape=jax.ShapeDtypeStruct((B, C_pad), out_dtype),
        grid=grid,
        in_specs=[x_spec, c_spec, v_spec],
        out_specs=o_spec,
        compiler_params=pltpu.CompilerParams(
            # Independent tiles along both axes -> shard across TensorCores.
            dimension_semantics=("parallel", "parallel"),
            vmem_limit_bytes=vmem_limit,
        ),
        cost_estimate=cost,
    )(x, c_padded, inv_c)

    return out if C_pad == C else out[:, :C]


def coco_linear_ref(x, centers, alpha):
    """Pure-JAX reference for correctness checking."""
    eps = 1e-12
    c_hat = centers / jnp.maximum(
        jnp.linalg.norm(centers, axis=-1, keepdims=True), eps)
    x_hat = alpha * x / jnp.maximum(
        jnp.linalg.norm(x, axis=-1, keepdims=True), eps)
    return x_hat @ c_hat.T


if __name__ == "__main__":
    # Module hyperparameters (synthetic, deterministic init).
    nfeat = 32      # embedding dimension
    nclass = 16     # number of classes
    alpha = 6.25    # normalization scaling factor
    batch = 8

    key = jax.random.PRNGKey(0)
    kx, kc = jax.random.split(key)

    centers = jax.random.normal(kc, (nclass, nfeat), dtype=jnp.float32)
    x = jax.random.normal(kx, (batch, nfeat), dtype=jnp.float32)

    expected = coco_linear_ref(x, centers, alpha)

    # Default fast path: bf16 MXU operands, f32 accumulation.
    logits = jax.block_until_ready(coco_linear(x, centers, alpha))
    assert logits.shape == (batch, nclass)
    assert jnp.allclose(logits, expected, atol=5e-2, rtol=5e-2), (
        "Pallas kernel (bf16 MXU) disagrees with reference")

    # Full-precision parity path.
    logits_f32 = jax.block_until_ready(
        coco_linear(x, centers, alpha, mm_dtype=jnp.float32))
    assert jnp.allclose(logits_f32, expected, atol=1e-4, rtol=1e-4), (
        "Pallas kernel (f32 MXU) disagrees with reference")

    print("KERNEL_OK")
</pallas_src>

<mosaic_0001>
module attributes {stable_mosaic.version = 11 : i64} {
  func.func @_coco_kernel(%arg0: i32, %arg1: i32, %arg2: memref<8x32xf32, #tpu.memory_space<vmem>>, %arg3: memref<128x32xf32, #tpu.memory_space<vmem>>, %arg4: memref<128x1xf32, #tpu.memory_space<vmem>>, %arg5: memref<8x128xf32, #tpu.memory_space<vmem>>) attributes {dimension_semantics = [#tpu.dimension_semantics<parallel>, #tpu.dimension_semantics<parallel>], iteration_bounds = array<i64: 1, 1>, scalar_prefetch = 0 : i64, scratch_operands = 0 : i64, tpu.core_type = #tpu.core_type<tc>, window_params = [{transform_indices = @transform_0, window_bounds = array<i64: 8, 32>}, {transform_indices = @transform_1, window_bounds = array<i64: 128, 32>}, {transform_indices = @transform_2, window_bounds = array<i64: 128, 1>}, {transform_indices = @transform_3, window_bounds = array<i64: 8, 128>}]} {
    %c0 = arith.constant 0 : index
    %c0_0 = arith.constant 0 : index
    %0 = vector.load %arg2[%c0, %c0_0] : memref<8x32xf32, #tpu.memory_space<vmem>>, vector<8x32xf32>
    %c0_1 = arith.constant 0 : index
    %c0_2 = arith.constant 0 : index
    %1 = vector.load %arg3[%c0_1, %c0_2] : memref<128x32xf32, #tpu.memory_space<vmem>>, vector<128x32xf32>
    %c0_3 = arith.constant 0 : index
    %c0_4 = arith.constant 0 : index
    %2 = vector.load %arg4[%c0_3, %c0_4] : memref<128x1xf32, #tpu.memory_space<vmem>>, vector<128x1xf32>
    %3 = arith.mulf %0, %0 : vector<8x32xf32>
    %cst = arith.constant dense<0.000000e+00> : vector<8xf32>
    %4 = vector.multi_reduction <add>, %3, %cst [1] : vector<8x32xf32> to vector<8xf32>
    %5 = vector.shape_cast %4 : vector<8xf32> to vector<8x1xf32>
    %cst_5 = arith.constant 1.000000e-24 : f32
    %6 = vector.broadcast %cst_5 : f32 to vector<8x1xf32>
    %7 = arith.maximumf %5, %6 : vector<8x1xf32>
    %8 = math.rsqrt %7 : vector<8x1xf32>
    %cst_6 = arith.constant 6.250000e+00 : f32
    %9 = vector.broadcast %cst_6 : f32 to vector<8x1xf32>
    %10 = arith.mulf %9, %8 : vector<8x1xf32>
    %11 = vector.broadcast %10 : vector<8x1xf32> to vector<8x32xf32>
    %12 = arith.mulf %0, %11 : vector<8x32xf32>
    %13 = vector.broadcast %2 : vector<128x1xf32> to vector<128x32xf32>
    %14 = arith.mulf %1, %13 : vector<128x32xf32>
    %15 = arith.truncf %12 : vector<8x32xf32> to vector<8x32xbf16>
    %16 = arith.truncf %14 : vector<128x32xf32> to vector<128x32xbf16>
    %cst_7 = arith.constant dense<0.000000e+00> : vector<8x128xf32>
    %17 = tpu.matmul %15, %16, %cst_7 {dimension_numbers = #tpu.dot_dimension_numbers<[1], [1], [0], [0], [0, 0, 1, 0], [], []>} : vector<8x32xbf16>, vector<128x32xbf16>, vector<8x128xf32> -> vector<8x128xf32>
    %c0_8 = arith.constant 0 : index
    %c0_9 = arith.constant 0 : index
    %18 = vector.load %arg5[%c0_8, %c0_9] : memref<8x128xf32, #tpu.memory_space<vmem>>, vector<8x128xf32>
    tpu.vector_store %arg5[%c0_8, %c0_9], %17 {strides = array<i32>} : memref<8x128xf32, #tpu.memory_space<vmem>>, vector<8x128xf32>,
    return
  }
  func.func @transform_0(%arg0: i32, %arg1: i32) -> (i32, i32) {
    %c0_i32 = arith.constant 0 : i32
    %c0_i32_0 = arith.constant 0 : i32
    return %arg0, %c0_i32 : i32, i32
  }
  func.func @transform_1(%arg0: i32, %arg1: i32) -> (i32, i32) {
    %c0_i32 = arith.constant 0 : i32
    %c0_i32_0 = arith.constant 0 : i32
    return %arg1, %c0_i32 : i32, i32
  }
  func.func @transform_2(%arg0: i32, %arg1: i32) -> (i32, i32) {
    %c0_i32 = arith.constant 0 : i32
    %c0_i32_0 = arith.constant 0 : i32
    return %arg1, %c0_i32 : i32, i32
  }
  func.func @transform_3(%arg0: i32, %arg1: i32) -> (i32, i32) {
    %c0_i32 = arith.constant 0 : i32
    return %arg0, %arg1 : i32, i32
  }
}

</mosaic_0001>

<bundles_post_ra>
// kernel: tpu_custom_call.1
= control target key start
LH: loop header
LB: loop body
LE: loop exit
PB: predicated region body
PF: predicated region fallthrough
CT: control target
= control target key end

     0   :  { %v305_v2 = vmov 0   ;;  %v306_v7 = vmov 0.0   ;;  %s455_s0 = inlined_call_operand.vmem [shape: f32[8,32], index: 0, kind: input, shape index: {}]   ;;  %s456_s1 = inlined_call_operand.vmem [shape: f32[128,32], index: 1, kind: input, shape index: {}]   ;;  %s457_s2 = inlined_call_operand.vmem [shape: f32[128,1], index: 2, kind: input, shape index: {}]   ;;  %s458_s3 = inlined_call_operand.hbm [shape: f32[8,128], index: 3, kind: output, shape index: {}]  }
   0x1   :  { %v47_v0 = vld [vmem:[%s457_s2 + $0x70] sm:$0xff]  ;;  %v45_v1 = vld [vmem:[%s457_s2 + $0x60] sm:$0xff]  ;;  %280 = vset.pattern.permute.xlu1 %v305_v2  ;;  %279 = vset.pattern.permute.xlu0 %v305_v2  ;;  %v48_v3 = vld [vmem:[%s457_s2 + $0x78] sm:$0xff] }
   0x2   :  { %130 = vperm.xlu0 %279, %v47_v0   ;;  %120 = vperm.xlu1 %280, %v45_v1   ;;  %v46_v4 = vld [vmem:[%s457_s2 + $0x68] sm:$0xff]  ;;  %v44_v5 = vld [vmem:[%s457_s2 + $0x58] sm:$0xff]  ;;  %v43_v6 = vld [vmem:[%s457_s2 + $0x50] sm:$0xff] }
   0x3   :  { %255 = vmatprep.subr.bf16.mxu0 %v306_v7 }
   0x6   :  { %135 = vperm.xlu0 %279, %v48_v3   ;;  %125 = vperm.xlu1 %280, %v46_v4  }
   0x7   :  { %8 = vsyncpa [#allocation3], 0  ;;  %v42_v8 = vld [vmem:[%s457_s2 + $0x48] sm:$0xff]  ;;  %v41_v9 = vld [vmem:[%s457_s2 + $0x40] sm:$0xff]  ;;  %vm50_vm0 = vcmask 261120   ;;  %vm307_vm1 = vmmov 0  }
   0x8   :  { %v40_v10 = vld [vmem:[%s457_s2 + $0x38] sm:$0xff]  ;;  %v39_v11 = vld [vmem:[%s457_s2 + $0x30] sm:$0xff]  ;;  %v37_v12 = vld [vmem:[%s457_s2 + $0x20] sm:$0xff]  ;;  %271 = vmatprep.mubr.msk.bf16.mxu0 %vm307_vm1, %v306_v7 }
   0x9   :  { %v38_v13 = vld [vmem:[%s457_s2 + $0x28] sm:$0xff]  ;;  %v35_v14 = vld [vmem:[%s457_s2 + $0x10] sm:$0xff]  ;;  %v36_v15 = vld [vmem:[%s457_s2 + $0x18] sm:$0xff] }
   0xa   :  { %115 = vperm.xlu1 %280, %v44_v5   ;;  %110 = vperm.xlu0 %279, %v43_v6   ;;  %v33_v16 = vld [vmem:[%s457_s2] sm:$0xff]  ;;  %v34_v17 = vld [vmem:[%s457_s2 + $0x8] sm:$0xff]  ;;  %v31_v23 = vld [vmem:[%s456_s1 + $0x70] sm:$0xff] }
   0xb   :  { %v381_v18 = vld [vmem:[%s455_s0] sm:$0xff]  ;;  %v32_v24 = vld [vmem:[%s456_s1 + $0x78] sm:$0xff]  ;;  %v30_v28 = vld [vmem:[%s456_s1 + $0x68] sm:$0xff] }
   0xc   :  { %v49_v19 = vmul.f32 %v381_v18, %v381_v18  ;;  %v29_v25 = vld [vmem:[%s456_s1 + $0x60] sm:$0xff]  ;;  %v28_v38 = vld [vmem:[%s456_s1 + $0x58] sm:$0xff]  ;;  %v27_v40 = vld [vmem:[%s456_s1 + $0x50] sm:$0xff] }
   0xd   :  { %v26_v46 = vld [vmem:[%s456_s1 + $0x48] sm:$0xff]  ;;  %v25_v48 = vld [vmem:[%s456_s1 + $0x40] sm:$0xff]  ;;  %v24_v54 = vld [vmem:[%s456_s1 + $0x38] sm:$0xff] }
   0xe   :  { %105 = vperm.xlu1 %280, %v42_v8   ;;  %100 = vperm.xlu0 %279, %v41_v9   ;;  %v51_v20 = vsel %vm50_vm0, %v49_v19, 0.0  ;;  %v23_v56 = vld [vmem:[%s456_s1 + $0x30] sm:$0xff]  ;;  %v22_v63 = vld [vmem:[%s456_s1 + $0x28] sm:$0xff]  ;;  %v21_v0 = vld [vmem:[%s456_s1 + $0x20] sm:$0xff] }
   0xf   :  { %v20_v6 = vld [vmem:[%s456_s1 + $0x18] sm:$0xff]  ;;  %v19_v8 = vld [vmem:[%s456_s1 + $0x10] sm:$0xff] }
  0x12   :  { %95 = vperm.xlu1 %280, %v40_v10   ;;  %90 = vperm.xlu0 %279, %v39_v11  }
  0x16   :  { %80 = vperm.xlu1 %280, %v37_v12  }
  0x1a   :  { %85 = vperm.xlu1 %280, %v38_v13  }
  0x1e   :  { %70 = vperm.xlu1 %280, %v35_v14  }
  0x22   :  { %75 = vperm.xlu1 %280, %v36_v15   ;;  %v18_v15 = vld [vmem:[%s456_s1 + $0x8] sm:$0xff] }
  0x26   :  { %60 = vperm.xlu1 %280, %v33_v16   ;;  %v17_v16 = vld [vmem:[%s456_s1] sm:$0xff]  ;;  %s308_s1 = smov [#allocation2]  }
  0x27   :  { %s237_s0 = sshll.u32 %s308_s1, 4  ;;  %s238_s0 = int_to_ptr.vmem [resolvable:$true] %s237_s0 }
  0x28   :  { %s283_s21 = scalar_lea.vmem %s238_s0, 128  ;;  %p288_p1 = scmp.lt.s32.totalorder %s238_s0, %s238_s0 }
  0x29   :  { %p284_p0 = scmp.ne.s32.totalorder %s238_s0, %s283_s21  ;;  %p289_p2 = scmp.lt.s32.totalorder %s283_s21, %s283_s21 }
  0x2a   :  { %65 = vperm.xlu1 %280, %v34_v17  }
  0x2b   :  { %p290_p3 = por %p289_p2, %p288_p1 }
  0x2d   :  { %p291_p4 = pnand %p290_p3, %p284_p0 }
  0x31   :  { %52 = vadd.xlane.f32.xlu0 %v51_v20 }
  0x7d   :  { %v131_v21 = vpop.permute.xlu0 %130  ;;  %v121_v22 = vpop.permute.xlu1 %120 }
  0x7e   :  { %v152_v29 = vmul.f32 %v131_v21, %v31_v23  ;;  %v150_v31 = vmul.f32 %v121_v22, %v29_v25 }
  0x81   :  { %v136_v26 = vpop.permute.xlu0 %135  ;;  %v126_v27 = vpop.permute.xlu1 %125 }
  0x82   :  { %v153_v30 = vmul.f32 %v136_v26, %v32_v24  ;;  %v151_v32 = vmul.f32 %v126_v27, %v30_v28 }
  0x84   :  { %v162_v33 = vpack.c.bf16 %v153_v30, %v152_v29  ;;  %v161_v36 = vpack.c.bf16 %v151_v32, %v150_v31 }
  0x85   :  { %v116_v34 = vpop.permute.xlu1 %115  ;;  %v111_v39 = vpop.permute.xlu0 %110 }
  0x86   :  { %v188_v35 = vsel %vm50_vm0, %v162_v33, 0  ;;  %v185_v41 = vsel %vm50_vm0, %v161_v36, 0  ;;  %v149_v42 = vmul.f32 %v116_v34, %v28_v38  ;;  %v148_v43 = vmul.f32 %v111_v39, %v27_v40 }
  0x87   :  { %256 = vmatpush3.bf16.xpose.msra.mxu0 %v188_v35 }
  0x88   :  { %257 = vmatprep.subr.bf16.mxu0 %v306_v7  ;;  %v160_v45 = vpack.c.bf16 %v149_v42, %v148_v43 }
  0x89   :  { %v106_v37 = vpop.permute.xlu1 %105  ;;  %v101_v47 = vpop.permute.xlu0 %100 }
  0x8a   :  { %v147_v50 = vmul.f32 %v106_v37, %v26_v46  ;;  %v146_v51 = vmul.f32 %v101_v47, %v25_v48  ;;  %v182_v52 = vsel %vm50_vm0, %v160_v45, 0 }
  0x8c   :  { %v159_v53 = vpack.c.bf16 %v147_v50, %v146_v51 }
  0x8d   :  { %v96_v44 = vpop.permute.xlu1 %95  ;;  %v91_v55 = vpop.permute.xlu0 %90 }
  0x8e   :  { %v145_v58 = vmul.f32 %v96_v44, %v24_v54  ;;  %v144_v59 = vmul.f32 %v91_v55, %v23_v56  ;;  %v179_v60 = vsel %vm50_vm0, %v159_v53, 0 }
  0x8f   :  { %258 = vmatpush3.bf16.xpose.msra.mxu0 %v185_v41 }
  0x90   :  { %259 = vmatprep.subr.bf16.mxu0 %v306_v7  ;;  %v158_v62 = vpack.c.bf16 %v145_v58, %v144_v59 }
  0x91   :  { %v81_v49 = vpop.permute.xlu1 %80 }
  0x92   :  { %v176_v2 = vsel %vm50_vm0, %v158_v62, 0  ;;  %v142_v4 = vmul.f32 %v81_v49, %v21_v0 }
  0x95   :  { %v86_v57 = vpop.permute.xlu1 %85 }
  0x96   :  { %v143_v1 = vmul.f32 %v86_v57, %v22_v63 }
  0x97   :  { %260 = vmatpush3.bf16.xpose.msra.mxu0 %v182_v52 }
  0x98   :  { %261 = vmatprep.subr.bf16.mxu0 %v306_v7  ;;  %v157_v5 = vpack.c.bf16 %v143_v1, %v142_v4 }
  0x99   :  { %v71_v61 = vpop.permute.xlu1 %70 }
  0x9a   :  { %v173_v11 = vsel %vm50_vm0, %v157_v5, 0  ;;  %v140_v12 = vmul.f32 %v71_v61, %v19_v8 }
  0x9d   :  { %v76_v3 = vpop.permute.xlu1 %75 }
  0x9e   :  { %v141_v10 = vmul.f32 %v76_v3, %v20_v6 }
  0x9f   :  { %262 = vmatpush3.bf16.xpose.msra.mxu0 %v179_v60 }
  0xa0   :  { %263 = vmatprep.subr.bf16.mxu0 %v306_v7  ;;  %v156_v13 = vpack.c.bf16 %v141_v10, %v140_v12 }
  0xa1   :  { %v61_v9 = vpop.permute.xlu1 %60 }
  0xa2   :  { %v170_v19 = vsel %vm50_vm0, %v156_v13, 0  ;;  %v138_v20 = vmul.f32 %v61_v9, %v17_v16 }
  0xa5   :  { %v66_v14 = vpop.permute.xlu1 %65 }
  0xa6   :  { %v139_v17 = vmul.f32 %v66_v14, %v18_v15 }
  0xa7   :  { %264 = vmatpush3.bf16.xpose.msra.mxu0 %v176_v2 }
  0xa8   :  { %265 = vmatprep.subr.bf16.mxu0 %v306_v7  ;;  %v155_v21 = vpack.c.bf16 %v139_v17, %v138_v20 }
  0xaa   :  { %v167_v24 = vsel %vm50_vm0, %v155_v21, 0 }
  0xaf   :  { %266 = vmatpush3.bf16.xpose.msra.mxu0 %v173_v11 }
  0xb0   :  { %267 = vmatprep.subr.bf16.mxu0 %v306_v7 }
  0xb7   :  { %268 = vmatpush3.bf16.xpose.msra.mxu0 %v170_v19 }
  0xb8   :  { %269 = vmatprep.subr.bf16.mxu0 %v306_v7 }
  0xba   :  { %v53_v22 = vpop.xlane.xlu0 %52 }
  0xbb   :  { %v54_v23 = vmax.f32 %v53_v22, 1e-24 }
  0xbd   :  { %281 = vrsqrt.f32 %v54_v23 }
  0xbf   :  { %270 = vmatpush3.bf16.xpose.msra.mxu0 %v167_v24 }
  0xca   :  { %v282_v25 = vpop.eup %281 }
  0xcb   :  { %v56_v26 = vmul.f32 6.25, %v282_v25 }
  0xcd   :  { %v57_v27 = vmul.f32 %v56_v26, %v381_v18 }
  0xcf   :  { %v154_v28 = vpack.c.bf16 %v57_v27, %v57_v27 }
  0xd1   :  { %272 = vmatmul.mubr.msk.bf16.vlgmr.msra.gmra.mxu0 %vm50_vm0, %v154_v28 }
 0x191   :  { %v224_v29 = vpop.f32.mrf.mxu0 }
 0x192   :  { %230 = vst [vmem:[#allocation2] sm:$0xff] %v224_v29 }
 0x193   :  { %v273_v7 = vpop.f32.mrf.mxu0 }
 0x194   :  { %294 = shalt.err (!%p291_p4)
}
 0x195   :  { %240 = dma.vmem_to_hbm [thread:$0]  %s238_s0, 128, %s458_s3, [#allocation3]   ;;  %v227_v18 = vpop.f32.mrf.mxu0 }
 0x197   :  { %v274_v30 = vpop.f32.mrf.mxu0 }
 0x198   :  { %303 = dma.done.wait [#allocation3], 128  }
 0x199   :  { %304 = vsyncadd [#allocation3], 4294967168 }
 0x19a   :  { %244 = vsyncpa [#allocation3], 1 }

</bundles_post_ra>
